<compile_context>
chip_gen: v5e
topology: v5e:2x2
jax: 0.10.0
libtpu: 0.0.40
codegen_flags: <defaults>
</compile_context>

<pallas_src>
import jax
import jax.numpy as jnp
from jax.experimental import pallas as pl
from jax.experimental.pallas import tpu as pltpu

N = 8          # number of nodes
F_IN = 4       # num_node_features
HID = 32       # hidden_channels
HEADS = 4      # GAT heads (concat=False -> mean over heads)
HN = HEADS * N
MLP_HID = 32   # anomaly / risk head hidden size
NEG_SLOPE = 0.2


def cloud_gnn_kernel(
    x_ref, a_self_ref, adj_bd_ref,
    w1t_ref, b1_ref,
    wg_stk_ref, c_src_ref, c_dst_rep_ref, rep_hsel_ref, rep_t_ref, bd_in_ref, bgat_ref,
    wsage_t_ref, bsl_ref,
    wh1t_ref, bh1_ref, wh2t_ref, bh2_ref,
    emb_ref, scores_ref,
):
    x = x_ref[...]
    a_self = a_self_ref[...]                          # adjacency with self loops [N, N]

    # derive plain adjacency (no self loops) in-kernel with an iota diagonal mask
    rows = jax.lax.broadcasted_iota(jnp.int32, (N, N), 0)
    cols = jax.lax.broadcasted_iota(jnp.int32, (N, N), 1)
    a_plain = jnp.where(rows == cols, 0.0, a_self)

    # ---------------- GCNConv: D^-1/2 (A+I) D^-1/2 (X W) + b, then ReLU ----------------
    h = jnp.dot(x, w1t_ref[...], preferred_element_type=jnp.float32)          # [N, HID]
    deg = jnp.sum(a_self, axis=1, keepdims=True)                              # degree incl. self
    d_is = jnp.where(deg > 0.0, jax.lax.rsqrt(deg), 0.0)                      # [N, 1] (EUP rsqrt)
    h = d_is * jnp.dot(a_self, d_is * h, preferred_element_type=jnp.float32)
    x1 = jnp.maximum(h + b1_ref[...], 0.0)
    # TODO(synk): F.dropout(p=0.2) is a no-op in eval mode; training-mode dropout not implemented.

    # ---------------- GATConv (heads=4, concat=False), ALL heads batched ----------------
    # block row layout: r = head*N + node
    x1_rep = jnp.concatenate([x1] * HEADS, axis=0)                            # [HN, HID]
    x1_bd = jnp.concatenate([x1_rep] * HEADS, axis=1) * bd_in_ref[...]        # [HN, HEADS*HID] blk-diag
    # per-head projections in one MXU op: hh_blk[h*N+j, :] = W_h @ x1_j
    hh_blk = jnp.dot(x1_bd, wg_stk_ref[...], preferred_element_type=jnp.float32)  # [HN, HID]

    # attention logits: e[h*N+i, h*N+j] = att_dst_h . (W_h x1_i) + att_src_h . (W_h x1_j)
    # a_dst as a column (VPU mul + lane reduce), a_src broadcast into lane blocks via MXU.
    a_dst_col = jnp.sum(x1_rep * c_dst_rep_ref[...], axis=-1, keepdims=True)  # [HN, 1]
    a_src_hn = jax.lax.dot_general(                                           # [HEADS, N]
        c_src_ref[...], x1,
        dimension_numbers=(((1,), (1,)), ((), ())),
        preferred_element_type=jnp.float32)
    a_src_bc = jnp.dot(rep_hsel_ref[...],
                       jnp.concatenate([a_src_hn] * HEADS, axis=1),
                       preferred_element_type=jnp.float32)                    # [HN, HN]

    e = a_dst_col + a_src_bc                                                  # [HN, HN]
    e = jnp.where(e > 0.0, e, NEG_SLOPE * e)                                  # leaky_relu(0.2)
    mask_bd = adj_bd_ref[...] > 0.0                                           # block-diag adjacency
    e = jnp.where(mask_bd, e, -1e30)
    m = jnp.max(e, axis=-1, keepdims=True)                                    # per (head, dst) max
    p = jnp.where(mask_bd, jnp.exp(e - m), 0.0)
    alpha = p * pl.reciprocal(jnp.sum(p, axis=-1, keepdims=True), approx=True)
    # alpha is block-diagonal -> single aggregation matmul for all heads
    acc_blk = jnp.dot(alpha, hh_blk, preferred_element_type=jnp.float32)      # [HN, HID]
    # mean over heads + bias + ReLU (head sum via one [N, HN] matmul)
    x2 = jnp.maximum(
        jnp.dot(rep_t_ref[...], acc_blk, preferred_element_type=jnp.float32) * (1.0 / HEADS)
        + bgat_ref[...], 0.0)                                                 # [N, HID]

    # ---------------- SAGEConv (mean aggr): lin_l(mean_j x_j) + lin_r(x_i), fused ----------
    deg_p = jnp.sum(a_plain, axis=1, keepdims=True)
    agg = jnp.dot(a_plain, x2, preferred_element_type=jnp.float32) \
        * pl.reciprocal(jnp.maximum(deg_p, 1.0), approx=True)
    emb = jnp.dot(jnp.concatenate([agg, x2], axis=1), wsage_t_ref[...],
                  preferred_element_type=jnp.float32) + bsl_ref[...]
    emb_ref[...] = emb

    # ---------------- fused anomaly + risk heads: Linear -> ReLU -> block Linear -> sigmoid --
    h1 = jnp.maximum(
        jnp.dot(emb, wh1t_ref[...], preferred_element_type=jnp.float32) + bh1_ref[...], 0.0)
    logits = jnp.dot(h1, wh2t_ref[...], preferred_element_type=jnp.float32) + bh2_ref[...]
    scores_ref[...] = jax.nn.sigmoid(logits)                                  # [N, 2]


def init_params(key):
    ks = jax.random.split(key, 16)
    f32 = jnp.float32

    def lin(k, out_d, in_d):
        return (jax.random.normal(k, (out_d, in_d), f32) / jnp.sqrt(jnp.asarray(in_d, f32)))

    return {
        # GCNConv
        "w1": lin(ks[0], HID, F_IN),
        "b1": jnp.zeros((1, HID), f32),
        # GATConv (lin weight [heads*out, in], att vectors [heads, out], bias [out])
        "w_gat": lin(ks[1], HEADS * HID, HID),
        "att_src": jax.random.normal(ks[2], (HEADS, HID), f32) * 0.1,
        "att_dst": jax.random.normal(ks[3], (HEADS, HID), f32) * 0.1,
        "b_gat": jnp.zeros((1, HID), f32),
        # SAGEConv (lin_l has bias, lin_r has no bias)
        "w_sage_l": lin(ks[4], HID, HID),
        "b_sage_l": jnp.zeros((1, HID), f32),
        "w_sage_r": lin(ks[5], HID, HID),
        # anomaly head
        "w_a1": lin(ks[6], MLP_HID, HID),
        "b_a1": jnp.zeros((1, MLP_HID), f32),
        "w_a2": lin(ks[7], 1, MLP_HID),
        "b_a2": jnp.zeros((1, 1), f32),
        # risk head
        "w_r1": lin(ks[8], MLP_HID, HID),
        "b_r1": jnp.zeros((1, MLP_HID), f32),
        "w_r2": lin(ks[9], 1, MLP_HID),
        "b_r2": jnp.zeros((1, 1), f32),
    }


def pack_params(params):
    """Host-side repack: pre-transpose / stack weights, fold att vectors into the GAT lin
    weight (c_src/c_dst), build the tiny block-layout helper matrices, fuse the SAGE linears
    and the anomaly/risk MLP heads. All zero-cost host work outside the kernel."""
    f32 = jnp.float32
    w_gat = params["w_gat"]                              # [HEADS*HID, HID]
    att_src, att_dst = params["att_src"], params["att_dst"]

    # per-head W^T stacked along rows: wg_stk[h*HID + k, d] = W_gat[h*HID + d, k]
    wg_stk = jnp.concatenate(
        [w_gat[h * HID:(h + 1) * HID, :].T for h in range(HEADS)], axis=0)    # [HEADS*HID, HID]
    # folded attention vectors: a_src[h, j] = (att_src[h] @ W_h) . x1_j  (same for dst)
    c_src = jnp.stack([att_src[h] @ w_gat[h * HID:(h + 1) * HID, :] for h in range(HEADS)], 0)
    c_dst = jnp.stack([att_dst[h] @ w_gat[h * HID:(h + 1) * HID, :] for h in range(HEADS)], 0)
    c_dst_rep = jnp.repeat(c_dst, N, axis=0)                                  # [HN, HID]

    # block-layout helper constants (pure index structure)
    rep_hsel = jnp.repeat(jnp.eye(HEADS, dtype=f32), N, axis=0)               # [HN, HEADS]
    rep_t = jnp.tile(jnp.eye(N, dtype=f32), (1, HEADS))                       # [N, HN]
    bd_in = jnp.kron(jnp.eye(HEADS, dtype=f32), jnp.ones((N, HID), f32))      # [HN, HEADS*HID]

    # fused SAGE: emb = concat([agg, x2]) @ [wsl^T ; wsr^T] + b_l
    w_sage_t = jnp.concatenate([params["w_sage_l"].T, params["w_sage_r"].T], axis=0)

    # fused MLP heads: [HID, 2*MLP_HID] hidden, block-structured [2*MLP_HID, 2] output
    wh1_t = jnp.concatenate([params["w_a1"].T, params["w_r1"].T], axis=1)
    bh1 = jnp.concatenate([params["b_a1"], params["b_r1"]], axis=1)
    wh2_t = jnp.zeros((2 * MLP_HID, 2), f32)
    wh2_t = wh2_t.at[:MLP_HID, 0:1].set(params["w_a2"].T)
    wh2_t = wh2_t.at[MLP_HID:, 1:2].set(params["w_r2"].T)
    bh2 = jnp.concatenate([params["b_a2"], params["b_r2"]], axis=1)

    return dict(
        w1_t=params["w1"].T, b1=params["b1"],
        wg_stk=wg_stk, c_src=c_src, c_dst_rep=c_dst_rep,
        rep_hsel=rep_hsel, rep_t=rep_t, bd_in=bd_in, b_gat=params["b_gat"],
        w_sage_t=w_sage_t, b_sl=params["b_sage_l"],
        wh1_t=wh1_t, bh1=bh1, wh2_t=wh2_t, bh2=bh2,
    )


def cloud_gnn_forward(x, edge_index, params):
    n = x.shape[0]
    p = pack_params(params)

    src, dst = edge_index[0], edge_index[1]
    # dense adjacency with self loops: A[i, j] = 1 iff edge j -> i (simple graph assumed)
    a_plain = jnp.zeros((n, n), jnp.float32).at[dst, src].set(1.0)
    a_self = jnp.maximum(a_plain, jnp.eye(n, dtype=jnp.float32))
    # block-diagonal adjacency for the batched GAT softmax mask
    adj_bd = jnp.kron(jnp.eye(HEADS, dtype=jnp.float32), a_self)              # [HN, HN]

    args = (
        x, a_self, adj_bd,
        p["w1_t"], p["b1"],
        p["wg_stk"], p["c_src"], p["c_dst_rep"], p["rep_hsel"], p["rep_t"], p["bd_in"],
        p["b_gat"],
        p["w_sage_t"], p["b_sl"],
        p["wh1_t"], p["bh1"], p["wh2_t"], p["bh2"],
    )
    vmem = pl.BlockSpec(memory_space=pltpu.MemorySpace.VMEM)
    out_shapes = (
        jax.ShapeDtypeStruct((n, HID), jnp.float32),  # embeddings
        jax.ShapeDtypeStruct((n, 2), jnp.float32),    # [anomaly, risk] sigmoid scores
    )
    emb, scores = pl.pallas_call(
        cloud_gnn_kernel,
        out_shape=out_shapes,
        in_specs=[vmem] * len(args),
        out_specs=(vmem, vmem),
    )(*args)
    return emb, scores[:, 0:1], scores[:, 1:2]


if __name__ == "__main__":
    key = jax.random.PRNGKey(0)
    kx, kp = jax.random.split(key)

    x = jax.random.normal(kx, (N, F_IN), jnp.float32)
    # deterministic simple directed graph (no self loops, no duplicate edges)
    src = jnp.array([i for i in range(N)] + [i for i in range(N)], jnp.int32)
    dst = jnp.array([(i + 1) % N for i in range(N)] + [(i + 3) % N for i in range(N)], jnp.int32)
    edge_index = jnp.stack([src, dst])  # [2, 16]

    params = init_params(kp)

    emb, ano, risk = jax.jit(cloud_gnn_forward)(x, edge_index, params)
    jax.block_until_ready((emb, ano, risk))

    assert emb.shape == (N, HID)
    assert ano.shape == (N, 1) and risk.shape == (N, 1)
    assert bool(jnp.all(jnp.isfinite(emb)))
    assert bool(jnp.all((ano >= 0) & (ano <= 1))) and bool(jnp.all((risk >= 0) & (risk <= 1)))
    print("KERNEL_OK")
</pallas_src>

<mosaic_0001>
module attributes {stable_mosaic.version = 11 : i64} {
  func.func @cloud_gnn_kernel(%arg0: memref<8x4xf32, #tpu.memory_space<vmem>>, %arg1: memref<8x8xf32, #tpu.memory_space<vmem>>, %arg2: memref<32x32xf32, #tpu.memory_space<vmem>>, %arg3: memref<4x32xf32, #tpu.memory_space<vmem>>, %arg4: memref<1x32xf32, #tpu.memory_space<vmem>>, %arg5: memref<128x32xf32, #tpu.memory_space<vmem>>, %arg6: memref<4x32xf32, #tpu.memory_space<vmem>>, %arg7: memref<32x32xf32, #tpu.memory_space<vmem>>, %arg8: memref<32x4xf32, #tpu.memory_space<vmem>>, %arg9: memref<8x32xf32, #tpu.memory_space<vmem>>, %arg10: memref<32x128xf32, #tpu.memory_space<vmem>>, %arg11: memref<1x32xf32, #tpu.memory_space<vmem>>, %arg12: memref<64x32xf32, #tpu.memory_space<vmem>>, %arg13: memref<1x32xf32, #tpu.memory_space<vmem>>, %arg14: memref<32x64xf32, #tpu.memory_space<vmem>>, %arg15: memref<1x64xf32, #tpu.memory_space<vmem>>, %arg16: memref<64x2xf32, #tpu.memory_space<vmem>>, %arg17: memref<1x2xf32, #tpu.memory_space<vmem>>, %arg18: memref<8x32xf32, #tpu.memory_space<vmem>>, %arg19: memref<8x2xf32, #tpu.memory_space<vmem>>) attributes {dimension_semantics = [], scalar_prefetch = 0 : i64, scratch_operands = 0 : i64, tpu.core_type = #tpu.core_type<tc>} {
    %c0 = arith.constant 0 : index
    %c0_0 = arith.constant 0 : index
    %0 = vector.load %arg0[%c0, %c0_0] : memref<8x4xf32, #tpu.memory_space<vmem>>, vector<8x4xf32>
    %c0_1 = arith.constant 0 : index
    %c0_2 = arith.constant 0 : index
    %1 = vector.load %arg1[%c0_1, %c0_2] : memref<8x8xf32, #tpu.memory_space<vmem>>, vector<8x8xf32>
    %2 = tpu.iota {dimensions = array<i32: 0>} : vector<8x8xi32>
    %3 = tpu.iota {dimensions = array<i32: 1>} : vector<8x8xi32>
    %4 = arith.cmpi eq, %2, %3 : vector<8x8xi32>
    %cst = arith.constant 0.000000e+00 : f32
    %5 = vector.broadcast %cst : f32 to vector<8x8xf32>
    %6 = arith.select %4, %5, %1 : vector<8x8xi1>, vector<8x8xf32>
    %c0_3 = arith.constant 0 : index
    %c0_4 = arith.constant 0 : index
    %7 = vector.load %arg3[%c0_3, %c0_4] : memref<4x32xf32, #tpu.memory_space<vmem>>, vector<4x32xf32>
    %cst_5 = arith.constant dense<0.000000e+00> : vector<8x32xf32>
    %8 = tpu.matmul %0, %7, %cst_5 {dimension_numbers = #tpu.dot_dimension_numbers<[1], [0], [0], [1], [0, 0, 1, 1], [], []>} : vector<8x4xf32>, vector<4x32xf32>, vector<8x32xf32> -> vector<8x32xf32>
    %cst_6 = arith.constant dense<0.000000e+00> : vector<8xf32>
    %9 = vector.multi_reduction <add>, %1, %cst_6 [1] : vector<8x8xf32> to vector<8xf32>
    %10 = vector.shape_cast %9 : vector<8xf32> to vector<8x1xf32>
    %cst_7 = arith.constant 0.000000e+00 : f32
    %11 = vector.broadcast %cst_7 : f32 to vector<8x1xf32>
    %12 = arith.cmpf ogt, %10, %11 : vector<8x1xf32>
    %13 = math.rsqrt %10 : vector<8x1xf32>
    %cst_8 = arith.constant 0.000000e+00 : f32
    %14 = vector.broadcast %cst_8 : f32 to vector<8x1xf32>
    %15 = arith.select %12, %13, %14 : vector<8x1xi1>, vector<8x1xf32>
    %16 = vector.broadcast %15 : vector<8x1xf32> to vector<8x32xf32>
    %17 = arith.mulf %16, %8 : vector<8x32xf32>
    %cst_9 = arith.constant dense<0.000000e+00> : vector<8x32xf32>
    %18 = tpu.matmul %1, %17, %cst_9 {dimension_numbers = #tpu.dot_dimension_numbers<[1], [0], [0], [1], [0, 0, 1, 1], [], []>} : vector<8x8xf32>, vector<8x32xf32>, vector<8x32xf32> -> vector<8x32xf32>
    %19 = vector.broadcast %15 : vector<8x1xf32> to vector<8x32xf32>
    %20 = arith.mulf %19, %18 : vector<8x32xf32>
    %c0_10 = arith.constant 0 : index
    %c0_11 = arith.constant 0 : index
    %21 = vector.load %arg4[%c0_10, %c0_11] : memref<1x32xf32, #tpu.memory_space<vmem>>, vector<1x32xf32>
    %22 = vector.broadcast %21 : vector<1x32xf32> to vector<8x32xf32>
    %23 = arith.addf %20, %22 : vector<8x32xf32>
    %cst_12 = arith.constant 0.000000e+00 : f32
    %24 = vector.broadcast %cst_12 : f32 to vector<8x32xf32>
    %25 = arith.maximumf %23, %24 : vector<8x32xf32>
    %26 = tpu.concatenate %25, %25, %25, %25 in 0 : vector<8x32xf32>, vector<8x32xf32>, vector<8x32xf32>, vector<8x32xf32> -> vector<32x32xf32>
    %27 = tpu.concatenate %26, %26, %26, %26 in 1 : vector<32x32xf32>, vector<32x32xf32>, vector<32x32xf32>, vector<32x32xf32> -> vector<32x128xf32>
    %c0_13 = arith.constant 0 : index
    %c0_14 = arith.constant 0 : index
    %28 = vector.load %arg10[%c0_13, %c0_14] : memref<32x128xf32, #tpu.memory_space<vmem>>, vector<32x128xf32>
    %29 = arith.mulf %27, %28 : vector<32x128xf32>
    %c0_15 = arith.constant 0 : index
    %c0_16 = arith.constant 0 : index
    %30 = vector.load %arg5[%c0_15, %c0_16] : memref<128x32xf32, #tpu.memory_space<vmem>>, vector<128x32xf32>
    %cst_17 = arith.constant dense<0.000000e+00> : vector<32x32xf32>
    %31 = tpu.matmul %29, %30, %cst_17 {dimension_numbers = #tpu.dot_dimension_numbers<[1], [0], [0], [1], [0, 0, 1, 1], [], []>} : vector<32x128xf32>, vector<128x32xf32>, vector<32x32xf32> -> vector<32x32xf32>
    %c0_18 = arith.constant 0 : index
    %c0_19 = arith.constant 0 : index
    %32 = vector.load %arg7[%c0_18, %c0_19] : memref<32x32xf32, #tpu.memory_space<vmem>>, vector<32x32xf32>
    %33 = arith.mulf %26, %32 : vector<32x32xf32>
    %cst_20 = arith.constant dense<0.000000e+00> : vector<32xf32>
    %34 = vector.multi_reduction <add>, %33, %cst_20 [1] : vector<32x32xf32> to vector<32xf32>
    %35 = vector.shape_cast %34 : vector<32xf32> to vector<32x1xf32>
    %c0_21 = arith.constant 0 : index
    %c0_22 = arith.constant 0 : index
    %36 = vector.load %arg6[%c0_21, %c0_22] : memref<4x32xf32, #tpu.memory_space<vmem>>, vector<4x32xf32>
    %cst_23 = arith.constant dense<0.000000e+00> : vector<4x8xf32>
    %37 = tpu.matmul %36, %25, %cst_23 {dimension_numbers = #tpu.dot_dimension_numbers<[1], [1], [0], [0], [0, 0, 1, 0], [], []>} : vector<4x32xf32>, vector<8x32xf32>, vector<4x8xf32> -> vector<4x8xf32>
    %c0_24 = arith.constant 0 : index
    %c0_25 = arith.constant 0 : index
    %38 = vector.load %arg8[%c0_24, %c0_25] : memref<32x4xf32, #tpu.memory_space<vmem>>, vector<32x4xf32>
    %39 = tpu.concatenate %37, %37, %37, %37 in 1 : vector<4x8xf32>, vector<4x8xf32>, vector<4x8xf32>, vector<4x8xf32> -> vector<4x32xf32>
    %cst_26 = arith.constant dense<0.000000e+00> : vector<32x32xf32>
    %40 = tpu.matmul %38, %39, %cst_26 {dimension_numbers = #tpu.dot_dimension_numbers<[1], [0], [0], [1], [0, 0, 1, 1], [], []>} : vector<32x4xf32>, vector<4x32xf32>, vector<32x32xf32> -> vector<32x32xf32>
    %41 = vector.broadcast %35 : vector<32x1xf32> to vector<32x32xf32>
    %42 = arith.addf %41, %40 : vector<32x32xf32>
    %cst_27 = arith.constant 0.000000e+00 : f32
    %43 = vector.broadcast %cst_27 : f32 to vector<32x32xf32>
    %44 = arith.cmpf ogt, %42, %43 : vector<32x32xf32>
    %cst_28 = arith.constant 2.000000e-01 : f32
    %45 = vector.broadcast %cst_28 : f32 to vector<32x32xf32>
    %46 = arith.mulf %45, %42 : vector<32x32xf32>
    %47 = arith.select %44, %42, %46 : vector<32x32xi1>, vector<32x32xf32>
    %c0_29 = arith.constant 0 : index
    %c0_30 = arith.constant 0 : index
    %48 = vector.load %arg2[%c0_29, %c0_30] : memref<32x32xf32, #tpu.memory_space<vmem>>, vector<32x32xf32>
    %cst_31 = arith.constant 0.000000e+00 : f32
    %49 = vector.broadcast %cst_31 : f32 to vector<32x32xf32>
    %50 = arith.cmpf ogt, %48, %49 : vector<32x32xf32>
    %cst_32 = arith.constant -1.000000e+30 : f32
    %51 = vector.broadcast %cst_32 : f32 to vector<32x32xf32>
    %52 = arith.select %50, %47, %51 : vector<32x32xi1>, vector<32x32xf32>
    %cst_33 = arith.constant dense<0xFF800000> : vector<32xf32>
    %53 = vector.multi_reduction <maximumf>, %52, %cst_33 [1] : vector<32x32xf32> to vector<32xf32>
    %54 = vector.shape_cast %53 : vector<32xf32> to vector<32x1xf32>
    %55 = vector.broadcast %54 : vector<32x1xf32> to vector<32x32xf32>
    %56 = arith.subf %52, %55 : vector<32x32xf32>
    %57 = math.exp %56 : vector<32x32xf32>
    %cst_34 = arith.constant 0.000000e+00 : f32
    %58 = vector.broadcast %cst_34 : f32 to vector<32x32xf32>
    %59 = arith.select %50, %57, %58 : vector<32x32xi1>, vector<32x32xf32>
    %cst_35 = arith.constant dense<0.000000e+00> : vector<32xf32>
    %60 = vector.multi_reduction <add>, %59, %cst_35 [1] : vector<32x32xf32> to vector<32xf32>
    %61 = vector.shape_cast %60 : vector<32xf32> to vector<32x1xf32>
    %62 = tpu.reciprocal %61 {approx = true} : vector<32x1xf32> -> vector<32x1xf32>
    %63 = vector.broadcast %62 : vector<32x1xf32> to vector<32x32xf32>
    %64 = arith.mulf %59, %63 : vector<32x32xf32>
    %cst_36 = arith.constant dense<0.000000e+00> : vector<32x32xf32>
    %65 = tpu.matmul %64, %31, %cst_36 {dimension_numbers = #tpu.dot_dimension_numbers<[1], [0], [0], [1], [0, 0, 1, 1], [], []>} : vector<32x32xf32>, vector<32x32xf32>, vector<32x32xf32> -> vector<32x32xf32>
    %c0_37 = arith.constant 0 : index
    %c0_38 = arith.constant 0 : index
    %66 = vector.load %arg9[%c0_37, %c0_38] : memref<8x32xf32, #tpu.memory_space<vmem>>, vector<8x32xf32>
    %cst_39 = arith.constant dense<0.000000e+00> : vector<8x32xf32>
    %67 = tpu.matmul %66, %65, %cst_39 {dimension_numbers = #tpu.dot_dimension_numbers<[1], [0], [0], [1], [0, 0, 1, 1], [], []>} : vector<8x32xf32>, vector<32x32xf32>, vector<8x32xf32> -> vector<8x32xf32>
    %cst_40 = arith.constant 2.500000e-01 : f32
    %68 = vector.broadcast %cst_40 : f32 to vector<8x32xf32>
    %69 = arith.mulf %67, %68 : vector<8x32xf32>
    %c0_41 = arith.constant 0 : index
    %c0_42 = arith.constant 0 : index
    %70 = vector.load %arg11[%c0_41, %c0_42] : memref<1x32xf32, #tpu.memory_space<vmem>>, vector<1x32xf32>
    %71 = vector.broadcast %70 : vector<1x32xf32> to vector<8x32xf32>
    %72 = arith.addf %69, %71 : vector<8x32xf32>
    %cst_43 = arith.constant 0.000000e+00 : f32
    %73 = vector.broadcast %cst_43 : f32 to vector<8x32xf32>
    %74 = arith.maximumf %72, %73 : vector<8x32xf32>
    %cst_44 = arith.constant dense<0.000000e+00> : vector<8xf32>
    %75 = vector.multi_reduction <add>, %6, %cst_44 [1] : vector<8x8xf32> to vector<8xf32>
    %76 = vector.shape_cast %75 : vector<8xf32> to vector<8x1xf32>
    %cst_45 = arith.constant dense<0.000000e+00> : vector<8x32xf32>
    %77 = tpu.matmul %6, %74, %cst_45 {dimension_numbers = #tpu.dot_dimension_numbers<[1], [0], [0], [1], [0, 0, 1, 1], [], []>} : vector<8x8xf32>, vector<8x32xf32>, vector<8x32xf32> -> vector<8x32xf32>
    %cst_46 = arith.constant 1.000000e+00 : f32
    %78 = vector.broadcast %cst_46 : f32 to vector<8x1xf32>
    %79 = arith.maximumf %76, %78 : vector<8x1xf32>
    %80 = tpu.reciprocal %79 {approx = true} : vector<8x1xf32> -> vector<8x1xf32>
    %81 = vector.broadcast %80 : vector<8x1xf32> to vector<8x32xf32>
    %82 = arith.mulf %77, %81 : vector<8x32xf32>
    %83 = tpu.concatenate %82, %74 in 1 : vector<8x32xf32>, vector<8x32xf32> -> vector<8x64xf32>
    %c0_47 = arith.constant 0 : index
    %c0_48 = arith.constant 0 : index
    %84 = vector.load %arg12[%c0_47, %c0_48] : memref<64x32xf32, #tpu.memory_space<vmem>>, vector<64x32xf32>
    %cst_49 = arith.constant dense<0.000000e+00> : vector<8x32xf32>
    %85 = tpu.matmul %83, %84, %cst_49 {dimension_numbers = #tpu.dot_dimension_numbers<[1], [0], [0], [1], [0, 0, 1, 1], [], []>} : vector<8x64xf32>, vector<64x32xf32>, vector<8x32xf32> -> vector<8x32xf32>
    %c0_50 = arith.constant 0 : index
    %c0_51 = arith.constant 0 : index
    %86 = vector.load %arg13[%c0_50, %c0_51] : memref<1x32xf32, #tpu.memory_space<vmem>>, vector<1x32xf32>
    %87 = vector.broadcast %86 : vector<1x32xf32> to vector<8x32xf32>
    %88 = arith.addf %85, %87 : vector<8x32xf32>
    %c0_52 = arith.constant 0 : index
    %c0_53 = arith.constant 0 : index
    %89 = vector.load %arg18[%c0_52, %c0_53] : memref<8x32xf32, #tpu.memory_space<vmem>>, vector<8x32xf32>
    tpu.vector_store %arg18[%c0_52, %c0_53], %88 {strides = array<i32>} : memref<8x32xf32, #tpu.memory_space<vmem>>, vector<8x32xf32>,
    %c0_54 = arith.constant 0 : index
    %c0_55 = arith.constant 0 : index
    %90 = vector.load %arg14[%c0_54, %c0_55] : memref<32x64xf32, #tpu.memory_space<vmem>>, vector<32x64xf32>
    %cst_56 = arith.constant dense<0.000000e+00> : vector<8x64xf32>
    %91 = tpu.matmul %88, %90, %cst_56 {dimension_numbers = #tpu.dot_dimension_numbers<[1], [0], [0], [1], [0, 0, 1, 1], [], []>} : vector<8x32xf32>, vector<32x64xf32>, vector<8x64xf32> -> vector<8x64xf32>
    %c0_57 = arith.constant 0 : index
    %c0_58 = arith.constant 0 : index
    %92 = vector.load %arg15[%c0_57, %c0_58] : memref<1x64xf32, #tpu.memory_space<vmem>>, vector<1x64xf32>
    %93 = vector.broadcast %92 : vector<1x64xf32> to vector<8x64xf32>
    %94 = arith.addf %91, %93 : vector<8x64xf32>
    %cst_59 = arith.constant 0.000000e+00 : f32
    %95 = vector.broadcast %cst_59 : f32 to vector<8x64xf32>
    %96 = arith.maximumf %94, %95 : vector<8x64xf32>
    %c0_60 = arith.constant 0 : index
    %c0_61 = arith.constant 0 : index
    %97 = vector.load %arg16[%c0_60, %c0_61] : memref<64x2xf32, #tpu.memory_space<vmem>>, vector<64x2xf32>
    %cst_62 = arith.constant dense<0.000000e+00> : vector<8x2xf32>
    %98 = tpu.matmul %96, %97, %cst_62 {dimension_numbers = #tpu.dot_dimension_numbers<[1], [0], [0], [1], [0, 0, 1, 1], [], []>} : vector<8x64xf32>, vector<64x2xf32>, vector<8x2xf32> -> vector<8x2xf32>
    %c0_63 = arith.constant 0 : index
    %c0_64 = arith.constant 0 : index
    %99 = vector.load %arg17[%c0_63, %c0_64] : memref<1x2xf32, #tpu.memory_space<vmem>>, vector<1x2xf32>
    %100 = vector.broadcast %99 : vector<1x2xf32> to vector<8x2xf32>
    %101 = arith.addf %98, %100 : vector<8x2xf32>
    %102 = arith.negf %101 : vector<8x2xf32>
    %103 = math.exp %102 : vector<8x2xf32>
    %cst_65 = arith.constant 1.000000e+00 : f32
    %104 = vector.broadcast %cst_65 : f32 to vector<8x2xf32>
    %105 = arith.addf %104, %103 : vector<8x2xf32>
    %106 = arith.divf %104, %105 : vector<8x2xf32>
    %c0_66 = arith.constant 0 : index
    %c0_67 = arith.constant 0 : index
    %107 = vector.load %arg19[%c0_66, %c0_67] : memref<8x2xf32, #tpu.memory_space<vmem>>, vector<8x2xf32>
    tpu.vector_store %arg19[%c0_66, %c0_67], %106 {strides = array<i32>} : memref<8x2xf32, #tpu.memory_space<vmem>>, vector<8x2xf32>,
    return
  }
}

</mosaic_0001>

<bundles_post_ra>
// kernel: tile.9
= control target key start
LH: loop header
LB: loop body
LE: loop exit
PB: predicated region body
PF: predicated region fallthrough
CT: control target
= control target key end

     0   :  { %vm36_vm0 = vcmask 1047556   ;;  %s81_s22 = smov 8   ;;  %s82_s23 = smov 16   ;;  %vm38_vm1 = vcmask 64512   ;;  %vm48_vm2 = vcmask 261312   ;;  %vm58_vm3 = vcmask 195712   ;;  %s133_s0 = inlined_call_operand.vmem [shape: f32[8,4,8], index: 0, kind: input, shape index: {}]   ;;  %s134_s1 = inlined_call_operand.vmem [shape: f32[8,32], index: 1, kind: output, shape index: {}]  }
   0x1   :  { %v70_v0 = vld [vmem:[%s133_s0 + $0x1c] sm:$0xf]  ;;  %v71_v1 = vld [vmem:[%s133_s0 + $0x18] sm:$0xf]  ;;  %v72_v2 = vld [vmem:[%s133_s0 + $0x14] sm:$0xf] }
   0x2   :  { %7 = vst [vmem:[#allocation0 + $0x38] sm:$0xf] %v70_v0  ;;  %v73_v3 = vld [vmem:[%s133_s0 + $0x10] sm:$0xf]  ;;  %v74_v4 = vld [vmem:[%s133_s0 + $0xc] sm:$0xf] }
   0x3   :  { %11 = vst [vmem:[#allocation0 + $0x30] sm:$0xf] %v71_v1  ;;  %v75_v5 = vld [vmem:[%s133_s0 + $0x8] sm:$0xf]  ;;  %v76_v6 = vld [vmem:[%s133_s0 + $0x4] sm:$0xf] }
   0x4   :  { %15 = vst [vmem:[#allocation0 + $0x28] sm:$0xf] %v72_v2  ;;  %v32_v7 = vld [vmem:[%s133_s0] sm:$0xf]  ;;  %s80_s0 = smov 24   ;;  %vm68_vm4 = vcmask 130112  }
   0x5   :  { %19 = vst [vmem:[#allocation0 + $0x20] sm:$0xf] %v73_v3 }
   0x6   :  { %23 = vst [vmem:[#allocation0 + $0x18] sm:$0xf] %v74_v4 }
   0x7   :  { %27 = vst [vmem:[#allocation0 + $0x10] sm:$0xf] %v75_v5 }
   0x8   :  { %31 = vst [vmem:[#allocation0 + $0x8] sm:$0xf] %v76_v6 }
   0x9   :  { %33 = vst [vmem:[#allocation0] sm:$0xf] %v32_v7 }
   0xc   :  { %v43_v8 = vld [vmem:[#allocation0 + $0x3] ss:$8 sm:$0xf0]   ;;  %v63_v9 = vld [vmem:[#allocation0 + $0x1] ss:$8 sm:$0xf0]  }
   0xd   :  { %v53_v15 = vld [vmem:[#allocation0 + $0x2] ss:$8 sm:$0xf0]   ;;  %v35_v18 = vld [vmem:[#allocation0] ss:$8 sm:$0xf0]  }
  0x10   :  { %v41_v10 = vld [vmem:[#allocation0 + $0x3] ss:$8 sm:$0xf]   ;;  %v61_v12 = vld [vmem:[#allocation0 + $0x1] ss:$8 sm:$0xf]  }
  0x11   :  { %v45_v11 = vsel %vm36_vm0, %v43_v8, %v41_v10  ;;  %v65_v13 = vsel %vm36_vm0, %v63_v9, %v61_v12  ;;  %v51_v14 = vld [vmem:[#allocation0 + $0x2] ss:$8 sm:$0xf]   ;;  %v34_v17 = vld [vmem:[#allocation0] ss:$8 sm:$0xf]  }
  0x12   :  { %46 = vrot.lane.b32.xlu0 %v45_v11, %s80_s0  ;;  %66 = vrot.lane.b32.xlu1 %v65_v13, %s81_s22  ;;  %v55_v16 = vsel %vm36_vm0, %v53_v15, %v51_v14  ;;  %v37_v19 = vsel %vm36_vm0, %v35_v18, %v34_v17 }
  0x13   :  { %39 = vst.msk [vmem:[%s134_s1] sm:$0xff] %vm38_vm1, %v37_v19  }
  0x1a   :  { %56 = vrot.lane.b32.xlu0 %v55_v16, %s82_s23 }
  0x84   :  { %v47_v20 = vpop.permute.xlu0 %46   ;;  %v67_v21 = vpop.permute.xlu1 %66  }
  0x85   :  { %49 = vst.msk [vmem:[%s134_s1] sm:$0xff] %vm48_vm2, %v47_v20  }
  0x8c   :  { %v57_v22 = vpop.permute.xlu0 %56  }
  0x8d   :  { %59 = vst.msk [vmem:[%s134_s1] sm:$0xff] %vm58_vm3, %v57_v22  }
  0x8e   :  { %69 = vst.msk [vmem:[%s134_s1] sm:$0xff] %vm68_vm4, %v67_v21  }

// kernel: cloud_gnn_forward.1
= control target key start
LH: loop header
LB: loop body
LE: loop exit
PB: predicated region body
PF: predicated region fallthrough
CT: control target
= control target key end

     0   :  { %s1095_s0 = inlined_call_operand.vmem [shape: f32[8,4], index: 0, kind: input, shape index: {}]   ;;  %s1096_s1 = inlined_call_operand.vmem [shape: f32[8,8], index: 1, kind: input, shape index: {}]   ;;  %s1097_s2 = inlined_call_operand.vmem [shape: f32[32,32], index: 2, kind: input, shape index: {}]   ;;  %s1098_s3 = inlined_call_operand.vmem [shape: f32[4,32], index: 3, kind: input, shape index: {}]   ;;  %s1099_s4 = inlined_call_operand.vmem [shape: f32[1,32], index: 4, kind: input, shape index: {}]   ;;  %s1100_s5 = inlined_call_operand.vmem [shape: f32[128,32], index: 5, kind: input, shape index: {}]   ;;  %s1101_s6 = inlined_call_operand.vmem [shape: f32[4,32], index: 6, kind: input, shape index: {}]   ;;  %s1102_s7 = inlined_call_operand.vmem [shape: f32[32,32], index: 7, kind: input, shape index: {}]   ;;  %s1103_s8 = inlined_call_operand.vmem [shape: f32[32,4], index: 8, kind: input, shape index: {}]   ;;  %s1104_s9 = inlined_call_operand.vmem [shape: f32[8,32], index: 9, kind: input, shape index: {}]   ;;  %s1105_s10 = inlined_call_operand.vmem [shape: f32[32,128], index: 10, kind: input, shape index: {}]   ;;  %s1106_s11 = inlined_call_operand.vmem [shape: f32[1,32], index: 11, kind: input, shape index: {}]   ;;  %s1107_s12 = inlined_call_operand.vmem [shape: f32[64,32], index: 12, kind: input, shape index: {}]   ;;  %s1108_s13 = inlined_call_operand.vmem [shape: f32[1,32], index: 13, kind: input, shape index: {}]   ;;  %s1109_s14 = inlined_call_operand.vmem [shape: f32[32,64], index: 14, kind: input, shape index: {}]   ;;  %s1110_s15 = inlined_call_operand.vmem [shape: f32[1,64], index: 15, kind: input, shape index: {}]   ;;  %s1111_s16 = inlined_call_operand.vmem [shape: f32[64,2], index: 16, kind: input, shape index: {}]   ;;  %s1112_s17 = inlined_call_operand.vmem [shape: f32[1,2], index: 17, kind: input, shape index: {}]   ;;  %s1113_s18 = inlined_call_operand.hbm [shape: f32[8,32], index: 18, kind: output, shape index: {0}]   ;;  %s1114_s19 = inlined_call_operand.vmem [shape: f32[8,2], index: 19, kind: output, shape index: {1}]  }
   0x1   :  { %1116 = sst [smem:[#allocation5_spill]] %s1095_s0 }
   0x2   :  { %1117 = sst [smem:[#allocation6_spill]] %s1096_s1 }
   0x3   :  { %1118 = sst [smem:[#allocation7_spill]] %s1097_s2 }
   0x4   :  { %1119 = sst [smem:[#allocation8_spill]] %s1098_s3 }
   0x5   :  { %s1120_s20 = sld [smem:[#allocation6_spill]]  ;;  %vm99_vm0 = vcmask 64512   ;;  %vm75_vm1 = vcmask 1043456   ;;  %vm71_vm2 = vcmask 31744  }
   0x6   :  { %s1121_s22 = sld [smem:[#allocation8_spill]] }
   0x7   :  { %s1122_s24 = sld [smem:[#allocation5_spill]] }
   0xb   :  { %v842_v0 = vld [vmem:[%s1120_s20] sm:$0xff] }
   0xc   :  { %v70_v1 = vld [vmem:[%s1121_s22] sm:$0xf]  ;;  %v100_v3 = vsel %vm99_vm0, %v842_v0, 0.0 }
   0xd   :  { %v62_v2 = vld [vmem:[%s1122_s24] sm:$0xff]  ;;  %650 = vmatpush.msk.msra.mxu0 %vm75_vm1, %v70_v1  ;;  %101 = vadd.xlane.f32.xlu0 %v100_v3 }
   0xe   :  { %651 = vmatmul.msk.f32.vlgmr.msra.gmra.mxu0 %vm71_vm2, %v62_v2 }
   0xf   :  { %25 = vsyncpa [#allocation3], 0  ;;  %v677_v15 = vld [vmem:[%s1099_s4] ss:$0 sm:$0xff]  ;;  %vm156_vm7 = vcmask 261120   ;;  %s732_s26 = smov 32  }
  0x10   :  { %v235_v20 = vld [vmem:[%s1101_s6] sm:$0xf]  ;;  %s733_s4 = smov 64   ;;  %v218_v24 = vld [vmem:[%s1102_s7 + $0x18] sm:$0xff]  ;;  %s734_s6 = smov 16   ;;  %v184_v29 = vld [vmem:[%s1100_s5 + $0x70] sm:$0xff] }
  0x11   :  { %v215_v21 = vld [vmem:[%s1102_s7] sm:$0xff]  ;;  %s735_s21 = smov 8   ;;  %s736_s1 = smov 24   ;;  %v185_v28 = vld [vmem:[%s1100_s5 + $0x78] sm:$0xff]  ;;  %v183_v30 = vld [vmem:[%s1100_s5 + $0x68] sm:$0xff]  ;;  %vm276_vm8 = vcmask 130048  }
  0x12   :  { %s737_s22 = smov 96   ;;  %186 = vmatpush.msra.mxu2 %v185_v28  ;;  %v182_v31 = vld [vmem:[%s1100_s5 + $0x60] sm:$0xff]  ;;  %v181_v32 = vld [vmem:[%s1100_s5 + $0x58] sm:$0xff]  ;;  %v217_v33 = vld [vmem:[%s1102_s7 + $0x10] sm:$0xff]  ;;  %vm278_vm9 = vcmask 195584   ;;  %vm158_vm10 = vcmask 523264  }
  0x13   :  { %v180_v34 = vld [vmem:[%s1100_s5 + $0x50] sm:$0xff]  ;;  %v216_v37 = vld [vmem:[%s1102_s7 + $0x8] sm:$0xff]  ;;  %v178_v41 = vld [vmem:[%s1100_s5 + $0x40] sm:$0xff]  ;;  %vm160_vm11 = vcmask 785408   ;;  %s1123_s25 = sld [smem:[#allocation7_spill]]  ;;  %s738_s7 = smov [#allocation2]  }
  0x14   :  { %187 = vmatpush.msra.mxu2 %v184_v29  ;;  %v179_v40 = vld [vmem:[%s1100_s5 + $0x48] sm:$0xff]  ;;  %v177_v42 = vld [vmem:[%s1100_s5 + $0x38] sm:$0xff]  ;;  %v176_v43 = vld [vmem:[%s1100_s5 + $0x30] sm:$0xff]  ;;  %s635_s28 = sshll.u32 %s738_s7, 4  ;;  %s636_s28 = int_to_ptr.vmem [resolvable:$true] %s635_s28 }
  0x15   :  { %v175_v44 = vld [vmem:[%s1100_s5 + $0x28] sm:$0xff]  ;;  %v174_v45 = vld [vmem:[%s1100_s5 + $0x20] sm:$0xff]  ;;  %v173_v46 = vld [vmem:[%s1100_s5 + $0x18] sm:$0xff] }
  0x16   :  { %188 = vmatpush.msra.mxu2 %v183_v30  ;;  %v172_v47 = vld [vmem:[%s1100_s5 + $0x10] sm:$0xff]  ;;  %v171_v48 = vld [vmem:[%s1100_s5 + $0x8] sm:$0xff]  ;;  %v170_v49 = vld [vmem:[%s1100_s5] sm:$0xff] }
  0x17   :  { %v261_v56 = vld [vmem:[%s1103_s8] sm:$0xff]  ;;  %v262_v63 = vld [vmem:[%s1103_s8 + $0x8] sm:$0xff] }
  0x18   :  { %189 = vmatpush.msra.mxu2 %v182_v31  ;;  %v162_v60 = vld [vmem:[%s1105_s10] sm:$0xff]  ;;  %v163_v3 = vld [vmem:[%s1105_s10 + $0x8] sm:$0xff] }
  0x19   :  { %v342_v30 = vld [vmem:[%s1123_s25 + $0x10] sm:$0xff] }
  0x1a   :  { %190 = vmatpush.msra.mxu2 %v181_v32 }
  0x1c   :  { %191 = vmatpush.msra.mxu2 %v180_v34 }
  0x1e   :  { %192 = vmatpush.msra.mxu2 %v179_v40 }
  0x20   :  { %193 = vmatpush.msra.mxu2 %v178_v41 }
  0x22   :  { %194 = vmatpush.msra.mxu2 %v177_v42 }
  0x24   :  { %195 = vmatpush.msra.mxu2 %v176_v43 }
  0x26   :  { %196 = vmatpush.msra.mxu2 %v175_v44 }
  0x28   :  { %197 = vmatpush.msra.mxu2 %v174_v45 }
  0x2a   :  { %198 = vmatpush.msra.mxu2 %v173_v46 }
  0x2c   :  { %199 = vmatpush.msra.mxu2 %v172_v47 }
  0x2e   :  { %200 = vmatpush.msra.mxu2 %v171_v48 }
  0x30   :  { %201 = vmatpush.msra.mxu2 %v170_v49 }
  0x80   :  { %v102_v4 = vpop.xlane.xlu0 %101 }
  0x81   :  { %682 = vrsqrt.f32 %v102_v4  ;;  %vm110_vm4 = vweird.f32 %v102_v4  ;;  %vm103_vm6 = vcmp.gt.f32.partialorder %v102_v4, 0.0 }
  0x87   :  { %v683_v5 = vpop.eup %682 }
  0x88   :  { %v105_v6 = vmul.f32 %v683_v5, %v102_v4  ;;  %vm111_vm3 = vweird.f32 %v683_v5  ;;  %v263_v4 = vld [vmem:[%s1103_s8 + $0x10] sm:$0xff] }
  0x89   :  { %vm112_vm5 = vmor %vm110_vm4, %vm111_vm3 }
  0x8a   :  { %v106_v7 = vmul.f32 %v683_v5, %v105_v6  ;;  %v164_v6 = vld [vmem:[%s1105_s10 + $0x10] sm:$0xff] }
  0x8b   :  { %v96_v11 = vpop.f32.mrf.mxu0 }
  0x8c   :  { %v107_v8 = vmul.f32 0.5, %v106_v7  ;;  %v264_v7 = vld [vmem:[%s1103_s8 + $0x18] sm:$0xff] }
  0x8e   :  { %v108_v9 = vsub.f32 1.5, %v107_v8 }
  0x90   :  { %v109_v10 = vmul.f32 %v683_v5, %v108_v9  ;;  %v165_v9 = vld [vmem:[%s1105_s10 + $0x18] sm:$0xff] }
  0x92   :  { %v113_v12 = vsel %vm112_vm5, %v683_v5, %v109_v10 }
  0x93   :  { %v114_v13 = vsel %vm103_vm6, %v113_v12, 0.0 }
  0x94   :  { %v115_v14 = vmul.f32 %v114_v13, %v96_v11 }
  0x96   :  { %134 = vmatpush.msra.mxu1 %v115_v14 }
  0x97   :  { %652 = vmatmul.msk.f32.vlgmr.msra.gmra.mxu1 %vm99_vm0, %v842_v0 }
 0x114   :  { %v136_v16 = vpop.f32.mrf.mxu1 }
 0x115   :  { %v139_v17 = vmul.f32 %v136_v16, %v114_v13  ;;  %v340_v13 = vld [vmem:[%s1123_s25] sm:$0xff] }
 0x116   :  { %vm344_vm13 = vcmp.gt.f32.partialorder %v340_v13, 0.0 }
 0x117   :  { %v144_v18 = vadd.f32 %v677_v15, %v139_v17 }
 0x119   :  { %v859_v19 = vmax.f32 %v144_v18, 0.0 }
 0x11b   :  { %147 = vrot.lane.b32.xlu2 %v859_v19, %s732_s26  ;;  %653 = vmatpush.xpose.msk.msra.mxu3 %vm156_vm7, %v859_v19  ;;  %v219_v22 = vmul.f32 %v215_v21, %v859_v19  ;;  %v222_v25 = vmul.f32 %v218_v24, %v859_v19  ;;  %v221_v35 = vmul.f32 %v217_v33, %v859_v19  ;;  %v341_v21 = vld [vmem:[%s1123_s25 + $0x8] sm:$0xff] }
 0x11c   :  { %v220_v38 = vmul.f32 %v216_v37, %v859_v19  ;;  %vm345_vm15 = vcmp.gt.f32.partialorder %v341_v21, 0.0 }
 0x11d   :  { %v223_v23 = vsel %vm156_vm7, %v219_v22, 0.0  ;;  %v232_v26 = vsel %vm156_vm7, %v222_v25, 0.0  ;;  %v229_v36 = vsel %vm156_vm7, %v221_v35, 0.0 }
 0x11e   :  { %654 = vmatmul.msk.f32.vlgmr.msra.gmra.mxu3 %vm156_vm7, %v235_v20  ;;  %v226_v39 = vsel %vm156_vm7, %v220_v38, 0.0 }
 0x123   :  { %150 = vrot.lane.b32.xlu2 %v859_v19, %s733_s4 }
 0x14c   :  { %224 = vadd.xlane.f32.xlu2 %v223_v23 }
 0x154   :  { %233 = vadd.xlane.f32.xlu2 %v232_v26 }
 0x175   :  { %v148_v52 = vpop.permute.xlu2 %147 }
 0x176   :  { %v157_v59 = vsel %vm156_vm7, %v859_v19, %v148_v52 }
 0x17d   :  { %v151_v58 = vpop.permute.xlu2 %150 }
 0x17e   :  { %v159_v61 = vsel %vm158_vm10, %v157_v59, %v151_v58 }
 0x1a1   :  { %v258_v27 = vpop.f32.mrf.mxu3 }
 0x1a2   :  { %269 = vrot.lane.b32.xlu1 %v258_v27, %s734_s6  ;;  %266 = vrot.lane.b32.xlu0 %v258_v27, %s735_s21 }
 0x1aa   :  { %272 = vrot.lane.b32.xlu1 %v258_v27, %s736_s1 }
 0x1b2   :  { %153 = vrot.lane.b32.xlu1 %v859_v19, %s737_s22 }
 0x1bf   :  { %v225_v11 = vpop.xlane.xlu2 %224 }
 0x1c7   :  { %v234_v37 = vpop.xlane.xlu2 %233 }
 0x1cc   :  { %230 = vadd.xlane.f32.xlu0 %v229_v36 }
 0x1dc   :  { %227 = vadd.xlane.f32.xlu1 %v226_v39  ;;  %v343_v39 = vld [vmem:[%s1123_s25 + $0x18] sm:$0xff] }
 0x1dd   :  { %vm347_vm4 = vcmp.gt.f32.partialorder %v343_v39, 0.0  ;;  %v508_v39 = vld [vmem:[%s1107_s12 + $0x10] sm:$0xff] }
 0x214   :  { %v270_v50 = vpop.permute.xlu1 %269  ;;  %v267_v51 = vpop.permute.xlu0 %266 }
 0x215   :  { %v275_v53 = vsel %vm99_vm0, %v258_v27, %v267_v51 }
 0x216   :  { %v277_v55 = vsel %vm276_vm8, %v275_v53, %v270_v50  ;;  %vm628_vm8 = vcmask 15360  }
 0x21c   :  { %v273_v54 = vpop.permute.xlu1 %272 }
 0x21d   :  { %v279_v57 = vsel %vm278_vm9, %v277_v55, %v273_v54 }
 0x21e   :  { %655 = vmatpush.msk.msrb.mxu0 %vm75_vm1, %v279_v57 }
 0x21f   :  { %656 = vmatmul.msk.f32.vlgmr.msrb.gmra.mxu0 %vm71_vm2, %v261_v56 }
 0x224   :  { %v154_v62 = vpop.permute.xlu1 %153 }
 0x225   :  { %v161_v1 = vsel %vm160_vm11, %v159_v61, %v154_v62 }
 0x226   :  { %v166_v2 = vmul.f32 %v162_v60, %v161_v1  ;;  %v167_v5 = vmul.f32 %v163_v3, %v161_v1  ;;  %v168_v8 = vmul.f32 %v164_v6, %v161_v1  ;;  %v169_v10 = vmul.f32 %v165_v9, %v161_v1 }
 0x227   :  { %657 = vmatmul.msk.f32.gmra.mxu0 %vm71_vm2, %v262_v63 }
 0x228   :  { %202 = vmatmul.f32.vlgmr.msra.gmra.mxu2 %v166_v2 }
 0x22f   :  { %658 = vmatmul.msk.f32.gmra.mxu0 %vm71_vm2, %v263_v4 }
 0x230   :  { %205 = vmatmul.f32.gmra.mxu2 %v167_v5 }
 0x237   :  { %659 = vmatmul.msk.f32.gmra.mxu0 %vm71_vm2, %v264_v7  ;;  %vm346_vm2 = vcmp.gt.f32.partialorder %v342_v30, 0.0  ;;  %v678_v30 = vld [vmem:[%s1106_s11] ss:$0 sm:$0xff] }
 0x238   :  { %208 = vmatmul.f32.gmra.mxu2 %v168_v8 }
 0x23f   :  { %v231_v28 = vpop.xlane.xlu0 %230 }
 0x240   :  { %211 = vmatmul.f32.gmra.mxu2 %v169_v10 }
 0x24f   :  { %v228_v19 = vpop.xlane.xlu1 %227 }
 0x29c   :  { %v312_v12 = vpop.f32.mrf.mxu0 }
 0x29d   :  { %v324_v14 = vadd.f32 %v312_v12, %v225_v11 }
 0x29f   :  { %v332_v15 = vmul.f32 0.2, %v324_v14  ;;  %vm328_vm12 = vcmp.gt.f32.partialorder %v324_v14, 0.0 }
 0x2a1   :  { %v336_v16 = vsel %vm328_vm12, %v324_v14, %v332_v15 }
 0x2a2   :  { %v348_v17 = vsel %vm344_vm13, %v336_v16, -1e+30 }
 0x2a3   :  { %v352_v18 = vsel %vm156_vm7, %v348_v17, -inf }
 0x2a4   :  { %v315_v20 = vpop.f32.mrf.mxu0  ;;  %353 = vmax.xlane.f32.xlu2 %v352_v18 }
 0x2a5   :  { %v325_v22 = vadd.f32 %v315_v20, %v228_v19 }
 0x2a7   :  { %v333_v23 = vmul.f32 0.2, %v325_v22  ;;  %vm329_vm14 = vcmp.gt.f32.partialorder %v325_v22, 0.0 }
 0x2a9   :  { %v337_v24 = vsel %vm329_vm14, %v325_v22, %v333_v23 }
 0x2aa   :  { %v349_v25 = vsel %vm345_vm15, %v337_v24, -1e+30  ;;  %v441_v24 = vld [vmem:[%s1104_s9] sm:$0xff] }
 0x2ab   :  { %v203_v26 = vpop.f32.mrf.mxu2  ;;  %v355_v27 = vsel %vm156_vm7, %v349_v25, -inf }
 0x2ac   :  { %v318_v29 = vpop.f32.mrf.mxu0  ;;  %356 = vmax.xlane.f32.xlu1 %v355_v27 }
 0x2ad   :  { %v326_v31 = vadd.f32 %v318_v29, %v231_v28 }
 0x2af   :  { %v334_v32 = vmul.f32 0.2, %v326_v31  ;;  %vm330_vm1 = vcmp.gt.f32.partialorder %v326_v31, 0.0 }
 0x2b1   :  { %v338_v33 = vsel %vm330_vm1, %v326_v31, %v334_v32 }
 0x2b2   :  { %v350_v34 = vsel %vm346_vm2, %v338_v33, -1e+30 }
 0x2b3   :  { %v206_v35 = vpop.f32.mrf.mxu2  ;;  %v358_v36 = vsel %vm156_vm7, %v350_v34, -inf }
 0x2b4   :  { %v321_v38 = vpop.f32.mrf.mxu0  ;;  %359 = vmax.xlane.f32.xlu0 %v358_v36  ;;  %v511_v36 = vld [vmem:[%s1107_s12 + $0x28] sm:$0xff] }
 0x2b5   :  { %v327_v40 = vadd.f32 %v321_v38, %v234_v37  ;;  %v510_v37 = vld [vmem:[%s1107_s12 + $0x20] sm:$0xff]  ;;  %v509_v38 = vld [vmem:[%s1107_s12 + $0x18] sm:$0xff] }
 0x2b7   :  { %v335_v41 = vmul.f32 0.2, %v327_v40  ;;  %vm331_vm3 = vcmp.gt.f32.partialorder %v327_v40, 0.0 }
 0x2b9   :  { %v339_v42 = vsel %vm331_vm3, %v327_v40, %v335_v41  ;;  %v507_v40 = vld [vmem:[%s1107_s12 + $0x8] sm:$0xff]  ;;  %v506_v41 = vld [vmem:[%s1107_s12] sm:$0xff] }
 0x2ba   :  { %v351_v43 = vsel %vm347_vm4, %v339_v42, -1e+30  ;;  %v545_v42 = vld [vmem:[%s1109_s14 + $0x18] sm:$0xff] }
 0x2bb   :  { %v209_v44 = vpop.f32.mrf.mxu2  ;;  %v361_v45 = vsel %vm156_vm7, %v351_v43, -inf  ;;  %565 = vmatpush.msra.mxu0 %v545_v42 }
 0x2bc   :  { %362 = vmax.xlane.f32.xlu2 %v361_v45 }
 0x2c3   :  { %v212_v46 = vpop.f32.mrf.mxu2 }
 0x2c4   :  { %424 = vmatpush.msrb.mxu1 %v212_v46 }
 0x2c6   :  { %425 = vmatpush.msrb.mxu1 %v209_v44  ;;  %v543_v44 = vld [vmem:[%s1109_s14 + $0x8] sm:$0xff] }
 0x2c8   :  { %426 = vmatpush.msrb.mxu1 %v206_v35  ;;  %v512_v35 = vld [vmem:[%s1107_s12 + $0x30] sm:$0xff] }
 0x2ca   :  { %427 = vmatpush.msrb.mxu1 %v203_v26 }
 0x317   :  { %v354_v47 = vpop.xlane.xlu2 %353 }
 0x318   :  { %v364_v48 = vsub.f32 %v348_v17, %v354_v47 }
 0x31a   :  { %v368_v49 = vmul.f32 1.442695, %v364_v48 }
 0x31c   :  { %684 = vpow2.f32 %v368_v49 }
 0x31f   :  { %v357_v50 = vpop.xlane.xlu1 %356 }
 0x320   :  { %v365_v51 = vsub.f32 %v349_v25, %v357_v50  ;;  %v64_v25 = vlaneseq }
 0x322   :  { %v685_v52 = vpop.eup %684  ;;  %v370_v53 = vmul.f32 1.442695, %v365_v51  ;;  %v65_v26 = vshrl.u32 %v64_v25, 7  ;;  %v67_v27 = vand.u32 127, %v64_v25 }
 0x323   :  { %v376_v54 = vsel %vm344_vm13, %v685_v52, 0.0  ;;  %v542_v52 = vld [vmem:[%s1109_s14] sm:$0xff] }
 0x324   :  { %686 = vpow2.f32 %v370_v53  ;;  %v380_v55 = vsel %vm156_vm7, %v376_v54, 0.0  ;;  %vm68_vm5 = vcmp.eq.s32.totalorder %v65_v26, %v67_v27  ;;  %v581_v53 = vld [vmem:[%s1111_s16 + $0x38] sm:$0xff] }
 0x325   :  { %381 = vadd.xlane.f32.xlu1 %v380_v55  ;;  %v69_v28 = vsel %vm68_vm5, 0.0, %v842_v0  ;;  %v513_v0 = vld [vmem:[%s1107_s12 + $0x38] sm:$0xff]  ;;  %597 = vmatpush.msra.mxu1 %v581_v53  ;;  %v579_v55 = vld [vmem:[%s1111_s16 + $0x28] sm:$0xff]  ;;  %s637_s12 = sshll.u32 %s1113_s18, 4  ;;  %s638_s12 = int_to_ptr.hbm [resolvable:$true] %s637_s12 }
 0x326   :  { %v472_v29 = vsel %vm99_vm0, %v69_v28, 0.0 }
 0x327   :  { %v360_v56 = vpop.xlane.xlu0 %359 }
 0x328   :  { %v366_v57 = vsub.f32 %v350_v34, %v360_v56  ;;  %v578_v56 = vld [vmem:[%s1111_s16 + $0x20] sm:$0xff] }
 0x32a   :  { %v687_v58 = vpop.eup %686  ;;  %v372_v59 = vmul.f32 1.442695, %v366_v57  ;;  %v577_v57 = vld [vmem:[%s1111_s16 + $0x18] sm:$0xff] }
 0x32b   :  { %v377_v60 = vsel %vm345_vm15, %v687_v58, 0.0  ;;  %v679_v58 = vld [vmem:[%s1108_s13] ss:$0 sm:$0xff] }
 0x32c   :  { %688 = vpow2.f32 %v372_v59  ;;  %v383_v61 = vsel %vm156_vm7, %v377_v60, 0.0 }
 0x32d   :  { %384 = vadd.xlane.f32.xlu0 %v383_v61  ;;  %v576_v61 = vld [vmem:[%s1111_s16 + $0x10] sm:$0xff] }
 0x32f   :  { %v363_v62 = vpop.xlane.xlu2 %362 }
 0x330   :  { %v367_v63 = vsub.f32 %v351_v43, %v363_v62  ;;  %v544_v43 = vld [vmem:[%s1109_s14 + $0x10] sm:$0xff]  ;;  %v575_v62 = vld [vmem:[%s1111_s16 + $0x8] sm:$0xff] }
 0x331   :  { %566 = vmatpush.msra.mxu0 %v544_v43 }
 0x332   :  { %v689_v1 = vpop.eup %688  ;;  %v374_v2 = vmul.f32 1.442695, %v367_v63  ;;  %v574_v63 = vld [vmem:[%s1111_s16] sm:$0xff] }
 0x333   :  { %v378_v3 = vsel %vm346_vm2, %v689_v1, 0.0  ;;  %567 = vmatpush.msra.mxu0 %v543_v44  ;;  %v680_v1 = vld [vmem:[%s1110_s15] ss:$0 sm:$0xff] }
 0x334   :  { %690 = vpow2.f32 %v374_v2  ;;  %v386_v4 = vsel %vm156_vm7, %v378_v3, 0.0 }
 0x335   :  { %387 = vadd.xlane.f32.xlu2 %v386_v4  ;;  %473 = vadd.xlane.f32.xlu0 %v472_v29 }
 0x336   :  { %568 = vmatpush.msra.mxu0 %v542_v52 }
 0x33a   :  { %v691_v5 = vpop.eup %690 }
 0x33b   :  { %v379_v6 = vsel %vm347_vm4, %v691_v5, 0.0  ;;  %v681_v5 = vld [vmem:[%s1112_s17] ss:$0 sm:$0xff] }
 0x33c   :  { %v389_v7 = vsel %vm156_vm7, %v379_v6, 0.0 }
 0x33d   :  { %390 = vadd.xlane.f32.xlu1 %v389_v7 }
 0x398   :  { %v382_v8 = vpop.xlane.xlu1 %381 }
 0x399   :  { %692 = vrcp.f32 %v382_v8 }
 0x39f   :  { %v693_v9 = vpop.eup %692 }
 0x3a0   :  { %v385_v10 = vpop.xlane.xlu0 %384  ;;  %v396_v11 = vmul.f32 %v693_v9, %v376_v54  ;;  %v580_v54 = vld [vmem:[%s1111_s16 + $0x30] sm:$0xff] }
 0x3a1   :  { %694 = vrcp.f32 %v385_v10  ;;  %598 = vmatpush.msra.mxu1 %v580_v54 }
 0x3a2   :  { %660 = vmatmul.msk.f32.vlgmr.msrb.gmra.mxu1 %vm156_vm7, %v396_v11 }
 0x3a3   :  { %599 = vmatpush.msra.mxu1 %v579_v55 }
 0x3a5   :  { %600 = vmatpush.msra.mxu1 %v578_v56 }
 0x3a7   :  { %v695_v12 = vpop.eup %694  ;;  %601 = vmatpush.msra.mxu1 %v577_v57 }
 0x3a8   :  { %v388_v13 = vpop.xlane.xlu2 %387  ;;  %v397_v14 = vmul.f32 %v695_v12, %v377_v60  ;;  %v474_v45 = vpop.xlane.xlu0 %473 }
 0x3a9   :  { %696 = vrcp.f32 %v388_v13  ;;  %v498_v46 = vmax.f32 %v474_v45, 1.0  ;;  %602 = vmatpush.msra.mxu1 %v576_v61 }
 0x3aa   :  { %661 = vmatmul.msk.f32.gmra.mxu1 %vm156_vm7, %v397_v14 }
 0x3ab   :  { %603 = vmatpush.msra.mxu1 %v575_v62 }
 0x3ad   :  { %604 = vmatpush.msra.mxu1 %v574_v63 }
 0x3af   :  { %v697_v15 = vpop.eup %696 }
 0x3b0   :  { %v391_v16 = vpop.xlane.xlu1 %390  ;;  %v398_v17 = vmul.f32 %v697_v15, %v378_v3 }
 0x3b1   :  { %698 = vrcp.f32 %v391_v16 }
 0x3b2   :  { %662 = vmatmul.msk.f32.gmra.mxu1 %vm156_vm7, %v398_v17  ;;  %700 = vrcp.f32 %v498_v46 }
 0x3b7   :  { %v699_v18 = vpop.eup %698 }
 0x3b8   :  { %v399_v19 = vmul.f32 %v699_v18, %v379_v6  ;;  %v701_v47 = vpop.eup %700 }
 0x3ba   :  { %663 = vmatmul.msk.f32.gmra.mxu1 %vm156_vm7, %v399_v19 }
 0x41f   :  { %v429_v20 = vpop.f32.mrf.mxu1 }
 0x427   :  { %v432_v21 = vpop.f32.mrf.mxu1 }
 0x42f   :  { %v435_v22 = vpop.f32.mrf.mxu1 }
 0x437   :  { %v438_v23 = vpop.f32.mrf.mxu1 }
 0x438   :  { %457 = vmatpush.msrb.mxu3 %v438_v23 }
 0x43a   :  { %458 = vmatpush.msrb.mxu3 %v435_v22 }
 0x43c   :  { %459 = vmatpush.msrb.mxu3 %v432_v21 }
 0x43e   :  { %460 = vmatpush.msrb.mxu3 %v429_v20 }
 0x43f   :  { %664 = vmatmul.msk.f32.vlgmr.msrb.gmra.mxu3 %vm156_vm7, %v441_v24 }
 0x4c2   :  { %v462_v31 = vpop.f32.mrf.mxu3 }
 0x4c3   :  { %v465_v32 = vmul.f32 0.25, %v462_v31 }
 0x4c5   :  { %v470_v33 = vadd.f32 %v678_v30, %v465_v32 }
 0x4c7   :  { %v471_v34 = vmax.f32 %v470_v33, 0.0 }
 0x4c9   :  { %502 = vrot.lane.b32.xlu2 %v471_v34, %s732_s26  ;;  %493 = vmatpush.msra.mxu3 %v471_v34 }
 0x4ca   :  { %665 = vmatmul.msk.f32.vlgmr.msra.gmra.mxu3 %vm99_vm0, %v69_v28 }
 0x4cb   :  { %529 = vmatpush.msrb.mxu3 %v513_v0 }
 0x4cd   :  { %530 = vmatpush.msrb.mxu3 %v512_v35 }
 0x4cf   :  { %531 = vmatpush.msrb.mxu3 %v511_v36 }
 0x4d1   :  { %532 = vmatpush.msrb.mxu3 %v510_v37 }
 0x4d3   :  { %533 = vmatpush.msrb.mxu3 %v509_v38 }
 0x4d5   :  { %534 = vmatpush.msrb.mxu3 %v508_v39 }
 0x4d7   :  { %535 = vmatpush.msrb.mxu3 %v507_v40 }
 0x4d9   :  { %536 = vmatpush.msrb.mxu3 %v506_v41 }
 0x523   :  { %v503_v50 = vpop.permute.xlu2 %502 }
 0x54d   :  { %v495_v48 = vpop.f32.mrf.mxu3 }
 0x54e   :  { %v500_v49 = vmul.f32 %v701_v47, %v495_v48 }
 0x550   :  { %v505_v51 = vsel %vm156_vm7, %v500_v49, %v503_v50 }
 0x551   :  { %666 = vmatmul.msk.f32.vlgmr.msrb.gmra.mxu3 %vm158_vm10, %v505_v51 }
 0x5d4   :  { %v538_v59 = vpop.f32.mrf.mxu3 }
 0x5d5   :  { %v539_v60 = vadd.f32 %v679_v58, %v538_v59 }
 0x5d7   :  { %541 = vst.msk [vmem:[#allocation2] sm:$0xff] %vm156_vm7, %v539_v60  ;;  %667 = vmatmul.msk.f32.vlgmr.msra.gmra.mxu0 %vm156_vm7, %v539_v60 }
 0x5d8   :  { %640 = dma.vmem_to_hbm [thread:$0]  %s636_s28, 128, %s638_s12, [#allocation3]  }
 0x654   :  { %v570_v2 = vpop.f32.mrf.mxu0 }
 0x655   :  { %v571_v3 = vadd.f32 %v680_v1, %v570_v2 }
 0x657   :  { %v573_v4 = vmax.f32 %v571_v3, 0.0 }
 0x659   :  { %668 = vmatmul.msk.f32.vlgmr.msra.gmra.mxu1 %vm158_vm10, %v573_v4 }
 0x6d6   :  { %v606_v6 = vpop.f32.mrf.mxu1 }
 0x6d7   :  { %v607_v7 = vadd.f32 %v681_v5, %v606_v6 }
 0x6d9   :  { %v669_v8 = vmul.f32 -1.442695, %v607_v7 }
 0x6db   :  { %702 = vpow2.f32 %v669_v8 }
 0x6e1   :  { %v703_v9 = vpop.eup %702 }
 0x6e2   :  { %v612_v10 = vadd.f32 1.0, %v703_v9 }
 0x6e4   :  { %704 = vrcp.f32 %v612_v10  ;;  %v624_v14 = vand.u32 2147483648, %v612_v10  ;;  %v622_v16 = vand.u32 2147483647, %v612_v10  ;;  %vm618_vm6 = vweird.f32 %v612_v10 }
 0x6e6   :  { %v625_v18 = vor.u32 1.1754944e-38, %v624_v14  ;;  %vm623_vm9 = vcmp.eq.f32.partialorder %v622_v16, 8.507059e+37 }
 0x6ea   :  { %v705_v11 = vpop.eup %704 }
 0x6eb   :  { %v614_v12 = vmul.f32 %v705_v11, %v612_v10  ;;  %vm619_vm0 = vweird.f32 %v705_v11 }
 0x6ec   :  { %vm620_vm7 = vmor %vm618_vm6, %vm619_vm0 }
 0x6ed   :  { %v615_v13 = vsub.f32 1.0, %v614_v12 }
 0x6ef   :  { %v616_v15 = vmul.f32 %v705_v11, %v615_v13 }
 0x6f1   :  { %v617_v17 = vadd.f32 %v705_v11, %v616_v15 }
 0x6f3   :  { %v621_v19 = vsel %vm620_vm7, %v705_v11, %v617_v17 }
 0x6f4   :  { %v626_v20 = vsel %vm623_vm9, %v625_v18, %v621_v19 }
 0x6f5   :  { %629 = vst.msk [vmem:[%s1114_s19] sm:$0xff] %vm628_vm8, %v626_v20 }
 0x6f6   :  { %730 = dma.done.wait [#allocation3], 128  }
 0x6f7   :  { %731 = vsyncadd [#allocation3], 4294967168 }
 0x6f8   :  { %649 = vsyncpa [#allocation3], 1 }

</bundles_post_ra>
